<compile_context>
chip_gen: v7x
topology: tpu7x:2x2x1
jax: 0.10.0
libtpu: 0.0.40
codegen_flags: <defaults>
</compile_context>

<pallas_src>
import jax
import jax.numpy as jnp
from jax.experimental import pallas as pl
from jax.experimental.pallas import tpu as pltpu

IN_FEATURES = 256
HIDDEN = 256
OUT_FEATURES = 256


def fused_mlp_kernel(x_ref, w1_ref, b1_ref, w2_ref, b2_ref, o_ref):
    # Cast the x tile to bf16 in-kernel (free VPU filler under the DMA/MXU
    # bottleneck; avoids an extra HBM pass in the wrapper).
    x = x_ref[...].astype(jnp.bfloat16)

    # layer1: x @ W1 + b1 -> ReLU.  W1 is pre-transposed to (in, out) so this
    # is a plain [M,K]@[K,N] MXU contraction with f32 accumulation.
    h = jnp.dot(x, w1_ref[...], preferred_element_type=jnp.float32) + b1_ref[...]
    h = jnp.maximum(h, 0.0).astype(jnp.bfloat16)

    # linear2: h @ W2 + b2.
    o_ref[...] = (
        jnp.dot(h, w2_ref[...], preferred_element_type=jnp.float32) + b2_ref[...]
    ).astype(o_ref.dtype)


def _round_up(n, m):
    return ((n + m - 1) // m) * m


def _choose_tb(B, tb):
    if B <= 8:
        # Tiny batch: a single block equal to the full batch dim (allowed even
        # when not a multiple of 8).  Pure launch-latency territory — a plain
        # XLA dot would also be fine here; we keep the Pallas path for parity.
        return B
    # Aim for >=4 grid steps (v7x has 2 TensorCores sharding the "parallel"
    # axis; >=4 steps also keeps each core's prefetch/writeback pipeline full),
    # capped at tb, rows a multiple of 8 to satisfy the (8,128) rule.
    return max(8, min(_round_up(tb, 8), _round_up(pl.cdiv(B, 4), 8)))


def pack_params(w1, b1, w2, b2):
    """One-time parameter packing (hoisted out of the per-call path).

    w1, w2 come in torch.nn.Linear layout (out, in); they are transposed to
    (in, out) and cast to bf16 once.  Biases are reshaped to (1, N) f32.
    """
    w1t = jnp.asarray(w1, jnp.float32).T.astype(jnp.bfloat16)   # (in, out)
    w2t = jnp.asarray(w2, jnp.float32).T.astype(jnp.bfloat16)   # (in, out)
    b1r = jnp.asarray(b1, jnp.float32).reshape(1, HIDDEN)
    b2r = jnp.asarray(b2, jnp.float32).reshape(1, OUT_FEATURES)
    return w1t, b1r, w2t, b2r


def mymodel_forward(x, packed_params, *, tb=2048, out_dtype=jnp.float32):
    """x: [B, 256] (any float dtype).  packed_params from pack_params().

    Returns [B, 256] in out_dtype (f32 by default to match the torch module).
    """
    w1t, b1r, w2t, b2r = packed_params
    B = x.shape[0]
    TB = _choose_tb(B, tb)
    grid = (pl.cdiv(B, TB),)   # ragged last block handled by Pallas write masking

    return pl.pallas_call(
        fused_mlp_kernel,
        out_shape=jax.ShapeDtypeStruct((B, OUT_FEATURES), out_dtype),
        grid=grid,
        in_specs=[
            pl.BlockSpec((TB, IN_FEATURES), lambda i: (i, 0)),            # x tile
            pl.BlockSpec((IN_FEATURES, HIDDEN), lambda i: (0, 0)),        # W1 (resident)
            pl.BlockSpec((1, HIDDEN), lambda i: (0, 0)),                  # b1 (resident)
            pl.BlockSpec((HIDDEN, OUT_FEATURES), lambda i: (0, 0)),       # W2 (resident)
            pl.BlockSpec((1, OUT_FEATURES), lambda i: (0, 0)),            # b2 (resident)
        ],
        out_specs=pl.BlockSpec((TB, OUT_FEATURES), lambda i: (i, 0)),
        compiler_params=pltpu.CompilerParams(
            dimension_semantics=("parallel",),
        ),
    )(x, w1t, b1r, w2t, b2r)


def init_params(key):
    """Deterministic torch.nn.Linear-style init: U(-1/sqrt(fan_in), 1/sqrt(fan_in))."""
    k1, k2, k3, k4 = jax.random.split(key, 4)
    bound1 = 1.0 / jnp.sqrt(jnp.float32(IN_FEATURES))
    bound2 = 1.0 / jnp.sqrt(jnp.float32(HIDDEN))
    w1 = jax.random.uniform(k1, (HIDDEN, IN_FEATURES), jnp.float32, -bound1, bound1)
    b1 = jax.random.uniform(k2, (HIDDEN,), jnp.float32, -bound1, bound1)
    w2 = jax.random.uniform(k3, (OUT_FEATURES, HIDDEN), jnp.float32, -bound2, bound2)
    b2 = jax.random.uniform(k4, (OUT_FEATURES,), jnp.float32, -bound2, bound2)
    return w1, b1, w2, b2


def reference_forward(x, w1, b1, w2, b2):
    h = jnp.maximum(x @ w1.T + b1, 0.0)
    return h @ w2.T + b2


if __name__ == "__main__":
    key = jax.random.PRNGKey(0)
    kx, kx2, kp = jax.random.split(key, 3)
    w1, b1, w2, b2 = init_params(kp)
    packed = pack_params(w1, b1, w2, b2)   # one-time param prep

    # Small-batch case (B=2): single full-batch block.
    B = 2
    x = jax.random.normal(kx, (B, IN_FEATURES), jnp.float32)
    out = jax.block_until_ready(mymodel_forward(x, packed))
    ref = reference_forward(x, w1, b1, w2, b2)
    assert out.shape == (B, OUT_FEATURES) and out.dtype == jnp.float32
    # bf16 MXU inputs with f32 accumulation -> relaxed tolerance vs f32 reference.
    assert jnp.allclose(out, ref, atol=2e-2, rtol=2e-2), float(jnp.max(jnp.abs(out - ref)))

    # Larger, non-divisible batch exercises the multi-step grid and the
    # masked ragged tail (no pad / slice copies).
    B2 = 700
    x2 = jax.random.normal(kx2, (B2, IN_FEATURES), jnp.float32)
    out2 = jax.block_until_ready(mymodel_forward(x2, packed))
    ref2 = reference_forward(x2, w1, b1, w2, b2)
    assert out2.shape == (B2, OUT_FEATURES)
    assert jnp.allclose(out2, ref2, atol=2e-2, rtol=2e-2), float(jnp.max(jnp.abs(out2 - ref2)))

    print("KERNEL_OK")
</pallas_src>

<mosaic_0001>
module attributes {stable_mosaic.version = 11 : i64} {
  func.func @fused_mlp_kernel(%arg0: i32, %arg1: memref<2x256xf32, #tpu.memory_space<vmem>>, %arg2: memref<256x256xbf16, #tpu.memory_space<vmem>>, %arg3: memref<1x256xf32, #tpu.memory_space<vmem>>, %arg4: memref<256x256xbf16, #tpu.memory_space<vmem>>, %arg5: memref<1x256xf32, #tpu.memory_space<vmem>>, %arg6: memref<2x256xf32, #tpu.memory_space<vmem>>) attributes {dimension_semantics = [#tpu.dimension_semantics<parallel>], iteration_bounds = array<i64: 1>, scalar_prefetch = 0 : i64, scratch_operands = 0 : i64, tpu.core_type = #tpu.core_type<tc>, window_params = [{transform_indices = @transform_0, window_bounds = array<i64: 2, 256>}, {pipeline_mode = #tpu.pipeline_mode<synchronous>, transform_indices = @transform_1, window_bounds = array<i64: 256, 256>}, {pipeline_mode = #tpu.pipeline_mode<synchronous>, transform_indices = @transform_2, window_bounds = array<i64: 1, 256>}, {pipeline_mode = #tpu.pipeline_mode<synchronous>, transform_indices = @transform_3, window_bounds = array<i64: 256, 256>}, {pipeline_mode = #tpu.pipeline_mode<synchronous>, transform_indices = @transform_4, window_bounds = array<i64: 1, 256>}, {transform_indices = @transform_5, window_bounds = array<i64: 2, 256>}]} {
    %c0 = arith.constant 0 : index
    %c0_0 = arith.constant 0 : index
    %0 = vector.load %arg1[%c0, %c0_0] : memref<2x256xf32, #tpu.memory_space<vmem>>, vector<2x256xf32>
    %1 = arith.truncf %0 : vector<2x256xf32> to vector<2x256xbf16>
    %c0_1 = arith.constant 0 : index
    %c0_2 = arith.constant 0 : index
    %2 = vector.load %arg2[%c0_1, %c0_2] : memref<256x256xbf16, #tpu.memory_space<vmem>>, vector<256x256xbf16>
    %cst = arith.constant dense<0.000000e+00> : vector<2x256xf32>
    %3 = tpu.matmul %1, %2, %cst {dimension_numbers = #tpu.dot_dimension_numbers<[1], [0], [0], [1], [0, 0, 1, 1], [], []>} : vector<2x256xbf16>, vector<256x256xbf16>, vector<2x256xf32> -> vector<2x256xf32>
    %c0_3 = arith.constant 0 : index
    %c0_4 = arith.constant 0 : index
    %4 = vector.load %arg3[%c0_3, %c0_4] : memref<1x256xf32, #tpu.memory_space<vmem>>, vector<1x256xf32>
    %5 = vector.broadcast %4 : vector<1x256xf32> to vector<2x256xf32>
    %6 = arith.addf %3, %5 : vector<2x256xf32>
    %cst_5 = arith.constant 0.000000e+00 : f32
    %7 = vector.broadcast %cst_5 : f32 to vector<2x256xf32>
    %8 = arith.maximumf %6, %7 : vector<2x256xf32>
    %9 = arith.truncf %8 : vector<2x256xf32> to vector<2x256xbf16>
    %c0_6 = arith.constant 0 : index
    %c0_7 = arith.constant 0 : index
    %10 = vector.load %arg4[%c0_6, %c0_7] : memref<256x256xbf16, #tpu.memory_space<vmem>>, vector<256x256xbf16>
    %cst_8 = arith.constant dense<0.000000e+00> : vector<2x256xf32>
    %11 = tpu.matmul %9, %10, %cst_8 {dimension_numbers = #tpu.dot_dimension_numbers<[1], [0], [0], [1], [0, 0, 1, 1], [], []>} : vector<2x256xbf16>, vector<256x256xbf16>, vector<2x256xf32> -> vector<2x256xf32>
    %c0_9 = arith.constant 0 : index
    %c0_10 = arith.constant 0 : index
    %12 = vector.load %arg5[%c0_9, %c0_10] : memref<1x256xf32, #tpu.memory_space<vmem>>, vector<1x256xf32>
    %13 = vector.broadcast %12 : vector<1x256xf32> to vector<2x256xf32>
    %14 = arith.addf %11, %13 : vector<2x256xf32>
    %c0_11 = arith.constant 0 : index
    %c0_12 = arith.constant 0 : index
    %15 = vector.load %arg6[%c0_11, %c0_12] : memref<2x256xf32, #tpu.memory_space<vmem>>, vector<2x256xf32>
    tpu.vector_store %arg6[%c0_11, %c0_12], %14 {strides = array<i32>} : memref<2x256xf32, #tpu.memory_space<vmem>>, vector<2x256xf32>,
    return
  }
  func.func @transform_0(%arg0: i32) -> (i32, i32) {
    %c0_i32 = arith.constant 0 : i32
    %c0_i32_0 = arith.constant 0 : i32
    return %arg0, %c0_i32 : i32, i32
  }
  func.func @transform_1(%arg0: i32) -> (i32, i32) {
    %c0_i32 = arith.constant 0 : i32
    %c0_i32_0 = arith.constant 0 : i32
    %c0_i32_1 = arith.constant 0 : i32
    return %c0_i32, %c0_i32_0 : i32, i32
  }
  func.func @transform_2(%arg0: i32) -> (i32, i32) {
    %c0_i32 = arith.constant 0 : i32
    %c0_i32_0 = arith.constant 0 : i32
    %c0_i32_1 = arith.constant 0 : i32
    return %c0_i32, %c0_i32_0 : i32, i32
  }
  func.func @transform_3(%arg0: i32) -> (i32, i32) {
    %c0_i32 = arith.constant 0 : i32
    %c0_i32_0 = arith.constant 0 : i32
    %c0_i32_1 = arith.constant 0 : i32
    return %c0_i32, %c0_i32_0 : i32, i32
  }
  func.func @transform_4(%arg0: i32) -> (i32, i32) {
    %c0_i32 = arith.constant 0 : i32
    %c0_i32_0 = arith.constant 0 : i32
    %c0_i32_1 = arith.constant 0 : i32
    return %c0_i32, %c0_i32_0 : i32, i32
  }
  func.func @transform_5(%arg0: i32) -> (i32, i32) {
    %c0_i32 = arith.constant 0 : i32
    %c0_i32_0 = arith.constant 0 : i32
    return %arg0, %c0_i32 : i32, i32
  }
}

</mosaic_0001>

<bundles_post_ra>
// kernel: tpu_custom_call.1
= control target key start
LH: loop header
LB: loop body
LE: loop exit
PB: predicated region body
PF: predicated region fallthrough
CT: control target
= control target key end

     0   :  { %10 = vsyncpa [#allocation3], 0  ;;  %s960_s0 = inlined_call_operand.hbm [shape: f32[2,256], index: 0, kind: input, shape index: {}]   ;;  %s961_s1 = inlined_call_operand.hbm [shape: bf16[256,256], index: 1, kind: input, shape index: {}]   ;;  %s962_s2 = inlined_call_operand.vmem [shape: f32[1,256], index: 2, kind: input, shape index: {}]   ;;  %s963_s3 = inlined_call_operand.hbm [shape: bf16[256,256], index: 3, kind: input, shape index: {}]   ;;  %s964_s4 = inlined_call_operand.vmem [shape: f32[1,256], index: 4, kind: input, shape index: {}]   ;;  %s965_s5 = inlined_call_operand.hbm [shape: f32[2,256], index: 5, kind: output, shape index: {}]  }
   0x1   :  { %11 = vsyncpa [#allocation6], 0 }
   0x2   :  { %12 = vsyncpa [#allocation4], 0  ;;  %s858_s18 = smov [#allocation5]   ;;  %s764_s22 = scalar_lea.hbm %s961_s1, 4096 }
   0x3   :  { %s28_s19 = sshll.u32 %s858_s18, 4  ;;  %p765_p0 = scmp.ne.s32.totalorder %s961_s1, %s764_s22  ;;  %s29_s19 = int_to_ptr.vmem [resolvable:$true] %s28_s19 }
   0x4   :  { %p768_p1 = scmp.lt.u32.totalorder %s764_s22, %s961_s1 }
   0x6   :  { %p770_p2 = pnand %p768_p1, %p765_p0 }
   0x8   :  { %773 = shalt.err (!%p770_p2)
}
   0x9   :  { %s774_s27 = scalar_lea.vmem %s29_s19, 4096  ;;  %p779_p4 = scmp.lt.s32.totalorder %s29_s19, %s29_s19 }
   0xa   :  { %p775_p3 = scmp.ne.s32.totalorder %s29_s19, %s774_s27  ;;  %p780_p5 = scmp.lt.s32.totalorder %s774_s27, %s774_s27 }
   0xc   :  { %p781_p6 = por %p780_p5, %p779_p4 }
   0xe   :  { %p782_p7 = pnand %p781_p6, %p775_p3 }
  0x10   :  { %785 = shalt.err (!%p782_p7)
}
  0x11   :  { %s859_s28 = smov 128   ;;  %s860_s29 = smov 8  }
  0x12   :  { %34 = dma.hbm_to_vmem [thread:$0]  %s961_s1, 4096, %s29_s19, [#allocation6], %s859_s28, %s859_s28, %s860_s29  }
  0x13   :  { %s861_s7 = smov [#allocation2]   ;;  %s862_s9 = smov [#allocation7]  }
  0x14   :  { %s19_s8 = sshll.u32 %s861_s7, 4  ;;  %s42_s10 = sshll.u32 %s862_s9, 4  ;;  %s20_s8 = int_to_ptr.vmem [resolvable:$true] %s19_s8  ;;  %s43_s10 = int_to_ptr.vmem [resolvable:$true] %s42_s10 }
  0x15   :  { %s786_s13 = scalar_lea.hbm %s960_s0, 64 }
  0x16   :  { %p787_p8 = scmp.ne.s32.totalorder %s960_s0, %s786_s13  ;;  %p790_p9 = scmp.lt.u32.totalorder %s786_s13, %s960_s0 }
  0x18   :  { %p792_p10 = pnand %p790_p9, %p787_p8 }
  0x1a   :  { %795 = shalt.err (!%p792_p10)
}
  0x1b   :  { %s796_s1 = scalar_lea.vmem %s20_s8, 64  ;;  %p801_p12 = scmp.lt.s32.totalorder %s20_s8, %s20_s8 }
  0x1c   :  { %p797_p11 = scmp.ne.s32.totalorder %s20_s8, %s796_s1  ;;  %p802_p13 = scmp.lt.s32.totalorder %s796_s1, %s796_s1 }
  0x1e   :  { %p803_p0 = por %p802_p13, %p801_p12 }
  0x20   :  { %p804_p1 = pnand %p803_p0, %p797_p11 }
  0x22   :  { %807 = shalt.err (!%p804_p1)
}
  0x23   :  { %22 = dma.hbm_to_vmem [thread:$0]  %s960_s0, 64, %s20_s8, [#allocation3]  }
  0x24   :  { %s808_s22 = scalar_lea.hbm %s963_s3, 4096 }
  0x25   :  { %p809_p2 = scmp.ne.s32.totalorder %s963_s3, %s808_s22  ;;  %p812_p3 = scmp.lt.u32.totalorder %s808_s22, %s963_s3 }
  0x27   :  { %p814_p4 = pnand %p812_p3, %p809_p2 }
  0x29   :  { %817 = shalt.err (!%p814_p4)
}
  0x2a   :  { %s818_s27 = scalar_lea.vmem %s43_s10, 4096  ;;  %p823_p6 = scmp.lt.s32.totalorder %s43_s10, %s43_s10 }
  0x2b   :  { %p819_p5 = scmp.ne.s32.totalorder %s43_s10, %s818_s27  ;;  %p824_p7 = scmp.lt.s32.totalorder %s818_s27, %s818_s27 }
  0x2d   :  { %p825_p8 = por %p824_p7, %p823_p6 }
  0x2f   :  { %p826_p9 = pnand %p825_p8, %p819_p5 }
  0x31   :  { %829 = shalt.err (!%p826_p9)
}
  0x32   :  { %48 = dma.hbm_to_vmem [thread:$0]  %s963_s3, 4096, %s43_s10, [#allocation6], %s859_s28, %s859_s28, %s860_s29  }
  0x33   :  { %852 = dma.done.wait [#allocation3], 64  }
  0x34   :  { %853 = vsyncadd [#allocation3], 4294967232 }
  0x35   :  { %854 = dma.done.wait [#allocation6], 8192  }
  0x36   :  { %855 = vsyncadd [#allocation6], 4294959104  ;;  %v668_v0 = vld [vmem:[#allocation5 + $0x4] ss:$8 sps:$4 sm:$0xff]   ;;  %v670_v1 = vld [vmem:[#allocation5] ss:$8 sps:$4 sm:$0xff]  }
  0x37   :  { %278 = vmatprep.subr.bf16.mxu0 %v668_v0  ;;  %v671_v2 = vld [vmem:[#allocation5 + $0x14] ss:$8 sps:$4 sm:$0xff]   ;;  %v673_v3 = vld [vmem:[#allocation5 + $0x10] ss:$8 sps:$4 sm:$0xff]   ;;  %v674_v4 = vld [vmem:[#allocation5 + $0x24] ss:$8 sps:$4 sm:$0xff]  }
  0x38   :  { %279 = vmatpush1.bf16.msra.mxu0 %v670_v1  ;;  %v676_v5 = vld [vmem:[#allocation5 + $0x20] ss:$8 sps:$4 sm:$0xff]   ;;  %v677_v6 = vld [vmem:[#allocation5 + $0x34] ss:$8 sps:$4 sm:$0xff]   ;;  %v679_v7 = vld [vmem:[#allocation5 + $0x30] ss:$8 sps:$4 sm:$0xff]  }
  0x39   :  { %280 = vmatprep.subr.bf16.mxu0 %v671_v2  ;;  %v680_v8 = vld [vmem:[#allocation5 + $0x44] ss:$8 sps:$4 sm:$0xff]   ;;  %v682_v9 = vld [vmem:[#allocation5 + $0x40] ss:$8 sps:$4 sm:$0xff]   ;;  %v683_v10 = vld [vmem:[#allocation5 + $0x54] ss:$8 sps:$4 sm:$0xff]  }
  0x3a   :  { %v685_v11 = vld [vmem:[#allocation5 + $0x50] ss:$8 sps:$4 sm:$0xff]   ;;  %v686_v12 = vld [vmem:[#allocation5 + $0x64] ss:$8 sps:$4 sm:$0xff]   ;;  %v688_v13 = vld [vmem:[#allocation5 + $0x60] ss:$8 sps:$4 sm:$0xff]  }
  0x3b   :  { %v936_v14 = vld.sshfl [vmem:[#allocation2] sm:$0x33 pattern:$0x76325410]  ;;  %v716_v16 = vld [vmem:[#allocation7 + $0x4] ss:$8 sps:$4 sm:$0xff]  }
  0x3c   :  { %281 = vmatpush1.bf16.msra.mxu0 %v673_v3  ;;  %v69_v15 = vcombine.high %v936_v14, %v936_v14  ;;  %v718_v17 = vld [vmem:[#allocation7] ss:$8 sps:$4 sm:$0xff]   ;;  %v689_v18 = vld [vmem:[#allocation5 + $0x74] ss:$8 sps:$4 sm:$0xff]   ;;  %527 = vmatprep.subr.bf16.mxu1 %v716_v16  ;;  %v721_v21 = vld [vmem:[#allocation7 + $0x10] ss:$8 sps:$4 sm:$0xff]   ;;  %v72_v57 = vpack.c.bf16 %v936_v14, %v936_v14 }
  0x3d   :  { %282 = vmatprep.subr.bf16.mxu0 %v674_v4  ;;  %v719_v20 = vld [vmem:[#allocation7 + $0x14] ss:$8 sps:$4 sm:$0xff]   ;;  %528 = vmatpush1.bf16.msra.mxu1 %v718_v17  ;;  %v722_v22 = vld [vmem:[#allocation7 + $0x24] ss:$8 sps:$4 sm:$0xff]   ;;  %v691_v23 = vld [vmem:[#allocation5 + $0x70] ss:$8 sps:$4 sm:$0xff]   ;;  %v108_v4 = vlaneseq }
  0x3e   :  { %v73_v19 = vpack.c.bf16 %v69_v15, %v69_v15  ;;  %529 = vmatprep.subr.bf16.mxu1 %v719_v20  ;;  %v692_v24 = vld [vmem:[#allocation5 + $0x84] ss:$8 sps:$4 sm:$0xff]   ;;  %v724_v25 = vld [vmem:[#allocation7 + $0x20] ss:$8 sps:$4 sm:$0xff]   ;;  %v725_v26 = vld [vmem:[#allocation7 + $0x34] ss:$8 sps:$4 sm:$0xff]  }
  0x3f   :  { %v694_v27 = vld [vmem:[#allocation5 + $0x80] ss:$8 sps:$4 sm:$0xff]   ;;  %v695_v28 = vld [vmem:[#allocation5 + $0x94] ss:$8 sps:$4 sm:$0xff]   ;;  %v727_v29 = vld [vmem:[#allocation7 + $0x30] ss:$8 sps:$4 sm:$0xff]  }
  0x40   :  { %283 = vmatpush1.bf16.msra.mxu0 %v676_v5  ;;  %310 = vmatprep.mubr.bf16.mxu0 %v73_v19  ;;  %v728_v30 = vld [vmem:[#allocation7 + $0x44] ss:$8 sps:$4 sm:$0xff]   ;;  %v697_v31 = vld [vmem:[#allocation5 + $0x90] ss:$8 sps:$4 sm:$0xff]   ;;  %v730_v33 = vld [vmem:[#allocation7 + $0x40] ss:$8 sps:$4 sm:$0xff]  }
  0x41   :  { %284 = vmatprep.subr.bf16.mxu0 %v677_v6  ;;  %530 = vmatpush1.bf16.msra.mxu1 %v721_v21  ;;  %v698_v32 = vld [vmem:[#allocation5 + $0xa4] ss:$8 sps:$4 sm:$0xff]   ;;  %v731_v34 = vld [vmem:[#allocation7 + $0x54] ss:$8 sps:$4 sm:$0xff]   ;;  %v700_v35 = vld [vmem:[#allocation5 + $0xa0] ss:$8 sps:$4 sm:$0xff]  }
  0x42   :  { %531 = vmatprep.subr.bf16.mxu1 %v722_v22  ;;  %v701_v36 = vld [vmem:[#allocation5 + $0xb4] ss:$8 sps:$4 sm:$0xff]   ;;  %v733_v37 = vld [vmem:[#allocation7 + $0x50] ss:$8 sps:$4 sm:$0xff]   ;;  %v734_v38 = vld [vmem:[#allocation7 + $0x64] ss:$8 sps:$4 sm:$0xff]  }
  0x43   :  { %v703_v39 = vld [vmem:[#allocation5 + $0xb0] ss:$8 sps:$4 sm:$0xff]   ;;  %v704_v40 = vld [vmem:[#allocation5 + $0xc4] ss:$8 sps:$4 sm:$0xff]   ;;  %v736_v41 = vld [vmem:[#allocation7 + $0x60] ss:$8 sps:$4 sm:$0xff]  }
  0x44   :  { %285 = vmatpush1.bf16.msra.mxu0 %v679_v7  ;;  %v737_v42 = vld [vmem:[#allocation7 + $0x74] ss:$8 sps:$4 sm:$0xff]   ;;  %v706_v43 = vld [vmem:[#allocation5 + $0xc0] ss:$8 sps:$4 sm:$0xff]   ;;  %v739_v45 = vld [vmem:[#allocation7 + $0x70] ss:$8 sps:$4 sm:$0xff]  }
  0x45   :  { %286 = vmatprep.subr.bf16.mxu0 %v680_v8  ;;  %532 = vmatpush1.bf16.msra.mxu1 %v724_v25  ;;  %v707_v44 = vld [vmem:[#allocation5 + $0xd4] ss:$8 sps:$4 sm:$0xff]   ;;  %v740_v46 = vld [vmem:[#allocation7 + $0x84] ss:$8 sps:$4 sm:$0xff]   ;;  %v709_v47 = vld [vmem:[#allocation5 + $0xd0] ss:$8 sps:$4 sm:$0xff]  }
  0x46   :  { %533 = vmatprep.subr.bf16.mxu1 %v725_v26  ;;  %v710_v48 = vld [vmem:[#allocation5 + $0xe4] ss:$8 sps:$4 sm:$0xff]   ;;  %v742_v49 = vld [vmem:[#allocation7 + $0x80] ss:$8 sps:$4 sm:$0xff]   ;;  %v743_v50 = vld [vmem:[#allocation7 + $0x94] ss:$8 sps:$4 sm:$0xff]  }
  0x47   :  { %v712_v51 = vld [vmem:[#allocation5 + $0xe0] ss:$8 sps:$4 sm:$0xff]   ;;  %v713_v52 = vld [vmem:[#allocation5 + $0xf4] ss:$8 sps:$4 sm:$0xff]   ;;  %v745_v53 = vld [vmem:[#allocation7 + $0x90] ss:$8 sps:$4 sm:$0xff]  }
  0x48   :  { %287 = vmatpush1.bf16.msra.mxu0 %v682_v9  ;;  %v746_v54 = vld [vmem:[#allocation7 + $0xa4] ss:$8 sps:$4 sm:$0xff]   ;;  %v715_v55 = vld [vmem:[#allocation5 + $0xf0] ss:$8 sps:$4 sm:$0xff]   ;;  %v748_v56 = vld [vmem:[#allocation7 + $0xa0] ss:$8 sps:$4 sm:$0xff]  }
  0x49   :  { %288 = vmatprep.subr.bf16.mxu0 %v683_v10  ;;  %534 = vmatpush1.bf16.msra.mxu1 %v727_v29  ;;  %v749_v58 = vld [vmem:[#allocation7 + $0xb4] ss:$8 sps:$4 sm:$0xff]   ;;  %v751_v59 = vld [vmem:[#allocation7 + $0xb0] ss:$8 sps:$4 sm:$0xff]   ;;  %v752_v60 = vld [vmem:[#allocation7 + $0xc4] ss:$8 sps:$4 sm:$0xff]  }
  0x4a   :  { %535 = vmatprep.subr.bf16.mxu1 %v728_v30  ;;  %v754_v61 = vld [vmem:[#allocation7 + $0xc0] ss:$8 sps:$4 sm:$0xff]   ;;  %v755_v62 = vld [vmem:[#allocation7 + $0xd4] ss:$8 sps:$4 sm:$0xff]   ;;  %v757_v63 = vld [vmem:[#allocation7 + $0xd0] ss:$8 sps:$4 sm:$0xff]  }
  0x4b   :  { %v758_v0 = vld [vmem:[#allocation7 + $0xe4] ss:$8 sps:$4 sm:$0xff]   ;;  %v760_v1 = vld [vmem:[#allocation7 + $0xe0] ss:$8 sps:$4 sm:$0xff]   ;;  %v761_v2 = vld [vmem:[#allocation7 + $0xf4] ss:$8 sps:$4 sm:$0xff]  }
  0x4c   :  { %289 = vmatpush1.bf16.msra.mxu0 %v685_v11  ;;  %v763_v3 = vld [vmem:[#allocation7 + $0xf0] ss:$8 sps:$4 sm:$0xff]   ;;  %v109_v5 = vshrl.u32 %v108_v4, 7  ;;  %v106_v7 = vld [vmem:[%s962_s2] sm:$0x3]  ;;  %s863_s2 = smov [#allocation8]  }
  0x4d   :  { %290 = vmatprep.subr.bf16.mxu0 %v686_v12  ;;  %536 = vmatpush1.bf16.msra.mxu1 %v730_v33  ;;  %v355_v21 = vld [vmem:[%s964_s4] sm:$0x3]  ;;  %s586_s7 = sshll.u32 %s863_s2, 4  ;;  %s587_s7 = int_to_ptr.vmem [resolvable:$true] %s586_s7 }
  0x4e   :  { %537 = vmatprep.subr.bf16.mxu1 %v731_v34  ;;  %v110_v6 = vsub.s32 0, %v109_v5  ;;  %v114_v8 = vsub.s32 1, %v109_v5  ;;  %s830_s8 = scalar_lea.vmem %s587_s7, 64  ;;  %p835_p11 = scmp.lt.s32.totalorder %s587_s7, %s587_s7 }
  0x4f   :  { %p831_p10 = scmp.ne.s32.totalorder %s587_s7, %s830_s8  ;;  %p836_p12 = scmp.lt.s32.totalorder %s830_s8, %s830_s8 }
  0x50   :  { %291 = vmatpush1.bf16.msra.mxu0 %v688_v13  ;;  %v111_v9 = vrot.slane %v106_v7, %v110_v6  ;;  %v115_v10 = vrot.slane %v106_v7, %v114_v8  ;;  %v360_v22 = vrot.slane %v355_v21, %v110_v6 }
  0x51   :  { %292 = vmatprep.subr.bf16.mxu0 %v689_v18  ;;  %538 = vmatpush1.bf16.msra.mxu1 %v733_v37  ;;  %p837_p13 = por %p836_p12, %p835_p11 }
  0x52   :  { %539 = vmatprep.subr.bf16.mxu1 %v734_v38 }
  0x53   :  { %p838_p0 = pnand %p837_p13, %p831_p10 }
  0x54   :  { %293 = vmatpush1.bf16.msra.mxu0 %v691_v23  ;;  %v364_v23 = vrot.slane %v355_v21, %v114_v8 }
  0x55   :  { %294 = vmatprep.subr.bf16.mxu0 %v692_v24  ;;  %540 = vmatpush1.bf16.msra.mxu1 %v736_v41 }
  0x56   :  { %541 = vmatprep.subr.bf16.mxu1 %v737_v42 }
  0x58   :  { %295 = vmatpush1.bf16.msra.mxu0 %v694_v27 }
  0x59   :  { %296 = vmatprep.subr.bf16.mxu0 %v695_v28  ;;  %542 = vmatpush1.bf16.msra.mxu1 %v739_v45 }
  0x5a   :  { %543 = vmatprep.subr.bf16.mxu1 %v740_v46 }
  0x5c   :  { %297 = vmatpush1.bf16.msra.mxu0 %v697_v31 }
  0x5d   :  { %298 = vmatprep.subr.bf16.mxu0 %v698_v32  ;;  %544 = vmatpush1.bf16.msra.mxu1 %v742_v49 }
  0x5e   :  { %545 = vmatprep.subr.bf16.mxu1 %v743_v50 }
  0x60   :  { %299 = vmatpush1.bf16.msra.mxu0 %v700_v35 }
  0x61   :  { %300 = vmatprep.subr.bf16.mxu0 %v701_v36  ;;  %546 = vmatpush1.bf16.msra.mxu1 %v745_v53 }
  0x62   :  { %547 = vmatprep.subr.bf16.mxu1 %v746_v54 }
  0x64   :  { %301 = vmatpush1.bf16.msra.mxu0 %v703_v39 }
  0x65   :  { %302 = vmatprep.subr.bf16.mxu0 %v704_v40  ;;  %548 = vmatpush1.bf16.msra.mxu1 %v748_v56 }
  0x66   :  { %549 = vmatprep.subr.bf16.mxu1 %v749_v58 }
  0x68   :  { %303 = vmatpush1.bf16.msra.mxu0 %v706_v43 }
  0x69   :  { %304 = vmatprep.subr.bf16.mxu0 %v707_v44  ;;  %550 = vmatpush1.bf16.msra.mxu1 %v751_v59 }
  0x6a   :  { %551 = vmatprep.subr.bf16.mxu1 %v752_v60 }
  0x6c   :  { %305 = vmatpush1.bf16.msra.mxu0 %v709_v47 }
  0x6d   :  { %306 = vmatprep.subr.bf16.mxu0 %v710_v48  ;;  %552 = vmatpush1.bf16.msra.mxu1 %v754_v61 }
  0x6e   :  { %553 = vmatprep.subr.bf16.mxu1 %v755_v62 }
  0x70   :  { %307 = vmatpush1.bf16.msra.mxu0 %v712_v51 }
  0x71   :  { %308 = vmatprep.subr.bf16.mxu0 %v713_v52  ;;  %554 = vmatpush1.bf16.msra.mxu1 %v757_v63 }
  0x72   :  { %555 = vmatprep.subr.bf16.mxu1 %v758_v0 }
  0x74   :  { %309 = vmatpush1.bf16.msra.mxu0 %v715_v55 }
  0x75   :  { %556 = vmatpush1.bf16.msra.mxu1 %v760_v1 }
  0x76   :  { %557 = vmatprep.subr.bf16.mxu1 %v761_v2 }
  0x77   :  { %311 = vmatmul.mubr.bf16.vlgmr.msra.gmra.mrb[0].mxu0 %v72_v57 }
  0x79   :  { %558 = vmatpush1.bf16.msra.mxu1 %v763_v3 }
 0x14a   :  { %v312_v11 = vpop.f32.mrb[0].mxu0 }
 0x14b   :  { %v313_v12 = vadd.f32 %v312_v11, %v111_v9  ;;  %v314_v13 = vpop.f32.mrb[1].mxu0 }
 0x14c   :  { %v315_v14 = vadd.f32 %v314_v13, %v115_v10  ;;  %v316_v15 = vpop.f32.mrb[2].mxu0 }
 0x14d   :  { %v319_v16 = vmax.f32 %v313_v12, 0.0  ;;  %v317_v17 = vpop.f32.mrb[3].mxu0 }
 0x14e   :  { %v320_v18 = vmax.f32 %v315_v14, 0.0 }
 0x14f   :  { %v321_v20 = vpack.c.bf16 %v319_v16, %v319_v16 }
 0x150   :  { %v322_v19 = vpack.c.bf16 %v320_v18, %v320_v18 }
 0x152   :  { %559 = vmatprep.mubr.bf16.mxu1 %v322_v19 }
 0x153   :  { %560 = vmatmul.mubr.bf16.vlgmr.msra.gmra.mrb[0].mxu1 %v321_v20 }
 0x226   :  { %v561_v24 = vpop.f32.mrb[0].mxu1 }
 0x227   :  { %v562_v25 = vadd.f32 %v561_v24, %v360_v22  ;;  %v563_v26 = vpop.f32.mrb[1].mxu1 }
 0x228   :  { %v564_v27 = vadd.f32 %v563_v26, %v364_v23  ;;  %v565_v28 = vpop.f32.mrb[2].mxu1 }
 0x229   :  { %v566_v29 = vpop.f32.mrb[3].mxu1 }
 0x22a   :  { %v570_v30 = vcombine.low %v562_v25, %v564_v27 }
 0x22c   :  { %661 = vst.sshfl [vmem:[#allocation8] sm:$0x33 pattern:$0x76325410] %v570_v30 }
 0x22d   :  { %841 = shalt.err (!%p838_p0)
}
 0x22e   :  { %s842_s10 = scalar_lea.hbm %s965_s5, 64 }
 0x22f   :  { %p843_p1 = scmp.ne.s32.totalorder %s965_s5, %s842_s10  ;;  %p846_p2 = scmp.lt.u32.totalorder %s842_s10, %s965_s5 }
 0x231   :  { %p848_p3 = pnand %p846_p2, %p843_p1 }
 0x233   :  { %851 = shalt.err (!%p848_p3)
}
 0x234   :  { %589 = dma.vmem_to_hbm [thread:$0]  %s587_s7, 64, %s965_s5, [#allocation4]  }
 0x235   :  { %856 = dma.done.wait [#allocation4], 64  }
 0x236   :  { %857 = vsyncadd [#allocation4], 4294967232 }
 0x237   :  { %593 = vsyncpa [#allocation3], 1 }
 0x238   :  { %594 = vsyncpa [#allocation6], 1 }
 0x239   :  { %595 = vsyncpa [#allocation4], 1 }

</bundles_post_ra>
